<compile_context>
chip_gen: v7x
topology: tpu7x:2x2x1
jax: 0.10.0
libtpu: 0.0.40
codegen_flags: <defaults>
</compile_context>

<pallas_src>
import functools

import jax
import jax.numpy as jnp
from jax.experimental import pallas as pl
from jax.experimental.pallas import tpu as pltpu


# ----------------------------------------------------------------------------
# Pallas kernel
# ----------------------------------------------------------------------------

def _round_up(x, m):
    return (x + m - 1) // m * m


def _adain_kernel(x_ref, wb_ref, o_ref, *, eps, n_true, n_pad):
    """x:(Tr, HWp) one row per (b, c) instance; wb:(Tr, 2) = [weight | bias]."""
    x = x_ref[...].astype(jnp.float32)
    inv_n = jnp.float32(1.0 / n_true)
    mean = jnp.sum(x, axis=-1, keepdims=True) * inv_n          # padded lanes are 0
    # centered (two-pass) variance; each zero-padded lane contributes mean^2,
    # subtract that exactly and divide by the true spatial size.
    ss = jnp.sum(jnp.square(x - mean), axis=-1, keepdims=True)
    if n_pad:
        ss = ss - jnp.float32(n_pad) * jnp.square(mean)
    var = ss * inv_n                                            # biased (1/N) variance
    scale = wb_ref[:, 0:1] * jax.lax.rsqrt(var + eps)           # fold weight into inv-std
    shift = wb_ref[:, 1:2] - mean * scale                       # fold mean into bias
    o_ref[...] = (x * scale + shift).astype(o_ref.dtype)        # single FMA per element


# ----------------------------------------------------------------------------
# Tiling / VMEM sizing helpers
# ----------------------------------------------------------------------------

def _vmem_budget_and_limit():
    """Derive block budget + vmem_limit from the actual chip's VMEM capacity."""
    cap = 64 * 1024 * 1024                                      # conservative (v7x) default
    try:
        info = pltpu.get_tpu_info()
        cap = int(getattr(info, "vmem_capacity_bytes", cap)) or cap
    except Exception:
        pass
    # v7x (64 MiB):  budget 24 MiB, limit 48 MiB.
    # v5e/v6e (128 MiB): budget 48 MiB, limit 96 MiB.
    budget = min(max(cap * 3 // 8, 16 * 1024 * 1024), 64 * 1024 * 1024)
    limit = min(max(cap * 3 // 4, budget + 8 * 1024 * 1024), 96 * 1024 * 1024)
    return budget, limit


def _pick_row_tile(rows, hw_pad, itemsize, budget_bytes):
    """Row-tile size: VMEM-bounded (incl. f32 temps), sublane-packed, >=2 grid steps."""
    sub = {1: 32, 2: 16}.get(itemsize, 8)                       # sublane packing per dtype
    # double-buffered in+out blocks (native dtype) + ~2 full-tile f32 temporaries
    per_row = hw_pad * (itemsize * 4 + 4 * 2)
    by_vmem = max(sub, (budget_bytes // per_row) // sub * sub)
    rows_up = _round_up(rows, sub)
    cap = max(sub, min(512, by_vmem, rows_up))
    # keep at least 2 grid steps so the DMA pipeline overlaps and v7x megacore shards
    if rows_up >= 2 * sub:
        cap = min(cap, max(sub, _round_up(rows_up // 2, sub)))
    # prefer a tile that divides rows exactly (no masked remainder block)
    for t in range(cap, sub - 1, -sub):
        if rows % t == 0:
            return t
    return cap


# ----------------------------------------------------------------------------
# Wrapper
# ----------------------------------------------------------------------------

def adaptive_instance_norm_2d(x, weight, bias, eps=1e-5):
    """AdaIN forward.  x: (B, C, H, W).  weight/bias: (B*C,) (or (C,), tiled per batch)."""
    B, C, H, W = x.shape
    rows, hw = B * C, H * W

    # weight/bias are assigned externally in the reference (assign_adain_params),
    # normally with B*C entries; accept (C,) as well and repeat per sample.
    w_flat = jnp.asarray(weight).reshape(-1)
    b_flat = jnp.asarray(bias).reshape(-1)
    if w_flat.shape[0] == C and rows != C:
        w_flat = jnp.tile(w_flat, B)
    if b_flat.shape[0] == C and rows != C:
        b_flat = jnp.tile(b_flat, B)
    assert w_flat.shape[0] == rows and b_flat.shape[0] == rows

    xr = x.reshape(rows, hw)                                    # free view, native dtype
    hw_pad = _round_up(hw, 128)
    if hw_pad != hw:
        # zero-pad lanes so kernel loads/stores stay lane-dense (unmasked vst)
        xr = jnp.pad(xr, ((0, 0), (0, hw_pad - hw)))

    wb = jnp.stack([w_flat, b_flat], axis=-1).astype(jnp.float32)   # (rows, 2)

    budget, vmem_limit = _vmem_budget_and_limit()
    tile_rows = _pick_row_tile(rows, hw_pad, jnp.dtype(x.dtype).itemsize, budget)
    grid = (pl.cdiv(rows, tile_rows),)

    out = pl.pallas_call(
        functools.partial(_adain_kernel, eps=float(eps),
                          n_true=hw, n_pad=hw_pad - hw),
        out_shape=jax.ShapeDtypeStruct((rows, hw_pad), x.dtype),
        grid=grid,
        in_specs=[
            pl.BlockSpec((tile_rows, hw_pad), lambda i: (i, 0)),    # full spatial row per block
            pl.BlockSpec((tile_rows, 2), lambda i: (i, 0)),         # packed [weight, bias]
        ],
        out_specs=pl.BlockSpec((tile_rows, hw_pad), lambda i: (i, 0)),
        compiler_params=pltpu.CompilerParams(
            dimension_semantics=("parallel",),                      # megacore sharding on v7x
            vmem_limit_bytes=vmem_limit,                            # chip-derived limit
        ),
    )(xr, wb)

    if hw_pad != hw:
        out = out[:, :hw]
    return out.reshape(B, C, H, W)

# TODO(synk): the training-mode update of running_mean / running_var is an in-place side
#             effect in PyTorch that never influences the returned tensor; not reproduced.
# TODO(synk): for extremely large spatial maps (single-row f32 working set of several MiB)
#             a two-pass HW-tiled variant ("arbitrary" reduction axis with VMEM sum/sumsq
#             accumulators) would be needed; not required for the shapes exercised here.


# ----------------------------------------------------------------------------
# Pure-JAX reference (for correctness check)
# ----------------------------------------------------------------------------

def adain_reference(x, weight, bias, eps=1e-5):
    B, C, H, W = x.shape
    xr = x.reshape(B * C, H * W).astype(jnp.float32)
    mean = xr.mean(axis=-1, keepdims=True)
    var = ((xr - mean) ** 2).mean(axis=-1, keepdims=True)
    w = weight.reshape(B * C, 1).astype(jnp.float32)
    b = bias.reshape(B * C, 1).astype(jnp.float32)
    out = (xr - mean) * jax.lax.rsqrt(var + eps) * w + b
    return out.reshape(B, C, H, W).astype(x.dtype)


# ----------------------------------------------------------------------------
# Main
# ----------------------------------------------------------------------------

if __name__ == "__main__":
    key = jax.random.PRNGKey(0)
    fwd = jax.jit(adaptive_instance_norm_2d)

    # config 1: small shape suggested by the module (single-block grid)
    # config 2: enough instances to exercise the multi-block, pipelined grid
    # config 3: H*W not a multiple of 128 to exercise the lane-padding path
    configs = [(2, 4, 16, 16), (4, 256, 16, 16), (2, 8, 12, 12)]
    for (B, C, H, W) in configs:
        kx, kw, kb, key = jax.random.split(key, 4)
        x = jax.random.normal(kx, (B, C, H, W), jnp.float32)
        weight = 1.0 + 0.5 * jax.random.normal(kw, (B * C,), jnp.float32)  # AdaIN "std"
        bias = jax.random.normal(kb, (B * C,), jnp.float32)                # AdaIN "mean"

        out = jax.block_until_ready(fwd(x, weight, bias))
        ref = adain_reference(x, weight, bias)

        assert out.shape == (B, C, H, W)
        assert bool(jnp.all(jnp.isfinite(out)))
        assert bool(jnp.allclose(out, ref, atol=1e-4, rtol=1e-4)), (
            f"mismatch at config {(B, C, H, W)}: "
            f"max abs err {float(jnp.max(jnp.abs(out - ref)))}")

    print("KERNEL_OK")
</pallas_src>

<mosaic_0001>
module attributes {stable_mosaic.version = 11 : i64} {
  func.func @_adain_kernel(%arg0: i32, %arg1: memref<8x256xf32, #tpu.memory_space<vmem>>, %arg2: memref<8x2xf32, #tpu.memory_space<vmem>>, %arg3: memref<8x256xf32, #tpu.memory_space<vmem>>) attributes {dimension_semantics = [#tpu.dimension_semantics<parallel>], iteration_bounds = array<i64: 1>, scalar_prefetch = 0 : i64, scratch_operands = 0 : i64, tpu.core_type = #tpu.core_type<tc>, window_params = [{transform_indices = @transform_0, window_bounds = array<i64: 8, 256>}, {transform_indices = @transform_1, window_bounds = array<i64: 8, 2>}, {transform_indices = @transform_2, window_bounds = array<i64: 8, 256>}]} {
    %c0 = arith.constant 0 : index
    %c0_0 = arith.constant 0 : index
    %0 = vector.load %arg1[%c0, %c0_0] : memref<8x256xf32, #tpu.memory_space<vmem>>, vector<8x256xf32>
    %cst = arith.constant dense<0.000000e+00> : vector<8xf32>
    %1 = vector.multi_reduction <add>, %0, %cst [1] : vector<8x256xf32> to vector<8xf32>
    %2 = vector.shape_cast %1 : vector<8xf32> to vector<8x1xf32>
    %cst_1 = arith.constant 3.906250e-03 : f32
    %3 = vector.broadcast %cst_1 : f32 to vector<8x1xf32>
    %4 = arith.mulf %2, %3 : vector<8x1xf32>
    %5 = vector.broadcast %4 : vector<8x1xf32> to vector<8x256xf32>
    %6 = arith.subf %0, %5 : vector<8x256xf32>
    %7 = arith.mulf %6, %6 : vector<8x256xf32>
    %cst_2 = arith.constant dense<0.000000e+00> : vector<8xf32>
    %8 = vector.multi_reduction <add>, %7, %cst_2 [1] : vector<8x256xf32> to vector<8xf32>
    %9 = vector.shape_cast %8 : vector<8xf32> to vector<8x1xf32>
    %cst_3 = arith.constant 3.906250e-03 : f32
    %10 = vector.broadcast %cst_3 : f32 to vector<8x1xf32>
    %11 = arith.mulf %9, %10 : vector<8x1xf32>
    %c0_4 = arith.constant 0 : index
    %c0_5 = arith.constant 0 : index
    %12 = vector.load %arg2[%c0_4, %c0_5] : memref<8x2xf32, #tpu.memory_space<vmem>>, vector<8x1xf32>
    %cst_6 = arith.constant 9.99999974E-6 : f32
    %13 = vector.broadcast %cst_6 : f32 to vector<8x1xf32>
    %14 = arith.addf %11, %13 : vector<8x1xf32>
    %15 = math.rsqrt %14 : vector<8x1xf32>
    %16 = arith.mulf %12, %15 : vector<8x1xf32>
    %c0_7 = arith.constant 0 : index
    %c1 = arith.constant 1 : index
    %17 = vector.load %arg2[%c0_7, %c1] : memref<8x2xf32, #tpu.memory_space<vmem>>, vector<8x1xf32>
    %18 = arith.mulf %4, %16 : vector<8x1xf32>
    %19 = arith.subf %17, %18 : vector<8x1xf32>
    %20 = vector.broadcast %16 : vector<8x1xf32> to vector<8x256xf32>
    %21 = arith.mulf %0, %20 : vector<8x256xf32>
    %22 = vector.broadcast %19 : vector<8x1xf32> to vector<8x256xf32>
    %23 = arith.addf %21, %22 : vector<8x256xf32>
    %c0_8 = arith.constant 0 : index
    %c0_9 = arith.constant 0 : index
    %24 = vector.load %arg3[%c0_8, %c0_9] : memref<8x256xf32, #tpu.memory_space<vmem>>, vector<8x256xf32>
    tpu.vector_store %arg3[%c0_8, %c0_9], %23 {strides = array<i32>} : memref<8x256xf32, #tpu.memory_space<vmem>>, vector<8x256xf32>,
    return
  }
  func.func @transform_0(%arg0: i32) -> (i32, i32) {
    %c0_i32 = arith.constant 0 : i32
    %c0_i32_0 = arith.constant 0 : i32
    return %arg0, %c0_i32 : i32, i32
  }
  func.func @transform_1(%arg0: i32) -> (i32, i32) {
    %c0_i32 = arith.constant 0 : i32
    %c0_i32_0 = arith.constant 0 : i32
    return %arg0, %c0_i32 : i32, i32
  }
  func.func @transform_2(%arg0: i32) -> (i32, i32) {
    %c0_i32 = arith.constant 0 : i32
    %c0_i32_0 = arith.constant 0 : i32
    return %arg0, %c0_i32 : i32, i32
  }
}

</mosaic_0001>

<bundles_post_ra>
// kernel: adaptive_instance_norm_2d.1
= control target key start
LH: loop header
LB: loop body
LE: loop exit
PB: predicated region body
PF: predicated region fallthrough
CT: control target
= control target key end

     0   :  { %v62_v10 = vmov 0   ;;  %v63_v14 = vmov 1   ;;  %s64_s14 = smov 1   ;;  %s95_s0 = inlined_call_operand.vmem [shape: f32[8,256], index: 0, kind: input, shape index: {}]   ;;  %s96_s1 = inlined_call_operand.vmem [shape: f32[8,2], index: 1, kind: input, shape index: {}]   ;;  %s97_s2 = inlined_call_operand.vmem [shape: f32[8,256], index: 2, kind: output, shape index: {}]  }
   0x1   :  { %v11_v0 = vld [vmem:[%s95_s0] sm:$0xff]  ;;  %v12_v1 = vld [vmem:[%s95_s0 + $0x8] sm:$0xff]  ;;  %58 = vset.pattern.permute.xlu1 %v62_v10  ;;  %59 = vset.pattern.permute.xlu0 %v63_v14 }
   0x2   :  { %v13_v2 = vadd.f32 %v12_v1, %v11_v0  ;;  %v25_v15 = vld [vmem:[%s96_s1] sm:$0xff] }
   0x4   :  { %14 = vadd.xlane.f32.xlu0 %v13_v2 }
  0x91   :  { %v15_v3 = vpop.xlane.xlu0 %14 }
  0x92   :  { %v16_v4 = vmul.f32 0.00390625, %v15_v3 }
  0x94   :  { %v17_v5 = vsub.f32 %v11_v0, %v16_v4  ;;  %v18_v6 = vsub.f32 %v12_v1, %v16_v4 }
  0x96   :  { %v19_v7 = vmul.f32 %v17_v5, %v17_v5  ;;  %v20_v8 = vmul.f32 %v18_v6, %v18_v6 }
  0x98   :  { %v21_v9 = vadd.f32 %v20_v8, %v19_v7 }
  0x9a   :  { %22 = vadd.xlane.f32.xlu0 %v21_v9 }
 0x127   :  { %v23_v11 = vpop.xlane.xlu0 %22 }
 0x128   :  { %v24_v12 = vmul.f32 0.00390625, %v23_v11 }
 0x12a   :  { %v26_v13 = vadd.f32 1e-05, %v24_v12 }
 0x12c   :  { %60 = vrsqrt.f32 %v26_v13 }
 0x136   :  { %v61_v16 = vpop.eup %60 }
 0x137   :  { %v28_v17 = vmul.f32 %v61_v16, %v25_v15 }
 0x139   :  { %v29_v18 = vmul.f32 %v28_v17, %v16_v4 }
 0x13b   :  { %31 = vrot.lane.b32.xlu1 %v29_v18, %s64_s14 }
 0x13f   :  { %37 = vperm.xlu1 %58, %v28_v17  }
 0x1ad   :  { %v32_v19 = vpop.permute.xlu1 %31 }
 0x1ae   :  { %v34_v20 = vsub.f32 %v25_v15, %v32_v19 }
 0x1b0   :  { %44 = vperm.xlu0 %59, %v34_v20  }
 0x1be   :  { %v38_v21 = vpop.permute.xlu1 %37 }
 0x1bf   :  { %v40_v22 = vmul.f32 %v38_v21, %v11_v0  ;;  %v41_v23 = vmul.f32 %v38_v21, %v12_v1 }
 0x22f   :  { %v45_v24 = vpop.permute.xlu0 %44 }
 0x230   :  { %v47_v25 = vadd.f32 %v45_v24, %v40_v22  ;;  %v48_v26 = vadd.f32 %v45_v24, %v41_v23 }
 0x232   :  { %49 = vst [vmem:[%s97_s2] sm:$0xff] %v47_v25  ;;  %50 = vst [vmem:[%s97_s2 + $0x8] sm:$0xff] %v48_v26 }

</bundles_post_ra>
